<compile_context>
chip_gen: v5e
topology: v5e:2x2
jax: 0.10.0
libtpu: 0.0.40
codegen_flags: <defaults>
</compile_context>

<pallas_src>
import functools

import jax
import jax.numpy as jnp
from jax.experimental import pallas as pl
from jax.experimental.pallas import tpu as pltpu


def _round_up(x: int, m: int) -> int:
    return (x + m - 1) // m * m


def _fused_linear_kernel(x_ref, w_ref, b_ref, o_ref, acc_ref):
    """One (tm, tn) output tile; accumulate over the K grid axis."""
    k = pl.program_id(2)

    @pl.when(k == 0)
    def _():
        acc_ref[...] = jnp.zeros_like(acc_ref)

    # bf16 x bf16 -> f32 accumulation on the MXU.
    acc_ref[...] += jnp.dot(
        x_ref[...], w_ref[...], preferred_element_type=jnp.float32
    )

    # Bias only in the epilogue (not once per K step), added in f32 before the
    # output cast (keeps the VPU path f32-only, safe on v5e).
    @pl.when(k == pl.num_programs(2) - 1)
    def _():
        o_ref[...] = (acc_ref[...] + b_ref[...]).astype(o_ref.dtype)


@functools.partial(jax.jit, static_argnames=("tm", "tn", "tk"))
def network_forward(x, w1, b1, w2, b2, *, tm=128, tn=256, tk=256):
    """y = (x @ w1 + b1) + (x @ w2 + b2), fused into one Pallas matmul."""
    B, D = x.shape
    H = w1.shape[1]
    out_dtype = x.dtype

    # --- Algebraic fusion of the two branches (done once, outside the kernel).
    w_sum = (w1 + w2).astype(jnp.float32)
    b_sum = (b1 + b2).reshape(1, H).astype(jnp.float32)

    # --- MXU operands in bf16 (v6e/v7x native); accumulation stays f32.
    compute_dtype = jnp.bfloat16
    x_c = x.astype(compute_dtype)
    w_c = w_sum.astype(compute_dtype)

    # --- Tile sizes: clamp to the (padded) problem, keep sublane/lane alignment
    #     (16 sublanes for bf16 operands, 128 lanes) and a lane-dense output.
    tm = min(tm, _round_up(B, 16))
    tn = min(tn, _round_up(H, 128))
    tk = min(tk, _round_up(D, 128))

    Bp, Dp, Hp = _round_up(B, tm), _round_up(D, tk), _round_up(H, tn)
    if (Bp, Dp) != (B, D):
        x_c = jnp.pad(x_c, ((0, Bp - B), (0, Dp - D)))
    if (Dp, Hp) != (D, H):
        w_c = jnp.pad(w_c, ((0, Dp - D), (0, Hp - H)))
    if Hp != H:
        b_sum = jnp.pad(b_sum, ((0, 0), (0, Hp - H)))

    grid = (Bp // tm, Hp // tn, Dp // tk)

    flops = 2 * Bp * Dp * Hp
    bytes_accessed = (
        x_c.size * x_c.dtype.itemsize
        + w_c.size * w_c.dtype.itemsize
        + b_sum.size * b_sum.dtype.itemsize
        + Bp * Hp * jnp.dtype(out_dtype).itemsize
    )

    out = pl.pallas_call(
        _fused_linear_kernel,
        out_shape=jax.ShapeDtypeStruct((Bp, Hp), out_dtype),
        grid_spec=pltpu.PrefetchScalarGridSpec(
            num_scalar_prefetch=0,
            grid=grid,
            in_specs=[
                pl.BlockSpec((tm, tk), lambda i, j, k: (i, k)),   # x tile
                pl.BlockSpec((tk, tn), lambda i, j, k: (k, j)),   # fused W tile
                pl.BlockSpec((1, tn), lambda i, j, k: (0, j)),    # fused bias
            ],
            out_specs=pl.BlockSpec((tm, tn), lambda i, j, k: (i, j)),
            scratch_shapes=[pltpu.VMEM((tm, tn), jnp.float32)],
        ),
        compiler_params=pltpu.CompilerParams(
            # Reduction axis last and "arbitrary"; M/N axes parallel (megacore).
            dimension_semantics=("parallel", "parallel", "arbitrary"),
            # Fits comfortably on v5e/v6e (128 MiB) and leaves headroom on
            # v7x's 64 MiB physical VMEM.
            vmem_limit_bytes=32 * 1024 * 1024,
        ),
        cost_estimate=pl.CostEstimate(
            flops=flops, transcendentals=0, bytes_accessed=bytes_accessed
        ),
    )(x_c, w_c, b_sum)

    if (Bp, Hp) != (B, H):
        out = out[:B, :H]
    return out


def _reference(x, w1, b1, w2, b2):
    return (x @ w1 + b1.reshape(1, -1)) + (x @ w2 + b2.reshape(1, -1))


def _make_inputs(key, B, D, H):
    k_x, k_w1, k_b1, k_w2, k_b2 = jax.random.split(key, 5)
    bound = 1.0 / (D ** 0.5)
    x = jax.random.normal(k_x, (B, D), dtype=jnp.float32)
    w1 = jax.random.uniform(k_w1, (D, H), minval=-bound, maxval=bound, dtype=jnp.float32)
    b1 = jax.random.uniform(k_b1, (1, H), minval=-bound, maxval=bound, dtype=jnp.float32)
    w2 = jax.random.uniform(k_w2, (D, H), minval=-bound, maxval=bound, dtype=jnp.float32)
    b2 = jax.random.uniform(k_b2, (1, H), minval=-bound, maxval=bound, dtype=jnp.float32)
    return x, w1, b1, w2, b2


if __name__ == "__main__":
    key = jax.random.PRNGKey(0)
    k1, k2 = jax.random.split(key)

    # Case 1: MXU/lane-aligned shapes, multi-tile grid (exercises K accumulation).
    B, D, H = 256, 512, 256
    x, w1, b1, w2, b2 = _make_inputs(k1, B, D, H)
    out = network_forward(x, w1, b1, w2, b2)
    jax.block_until_ready(out)
    ref = _reference(x, w1, b1, w2, b2)
    assert out.shape == (B, H)
    assert jnp.allclose(out, ref, atol=2e-2, rtol=2e-2), "case 1 mismatch"

    # Case 2: small, unaligned shapes (exercises the padding / single-tile path).
    Bs, Ds, Hs = 8, 32, 32
    xs, w1s, b1s, w2s, b2s = _make_inputs(k2, Bs, Ds, Hs)
    outs = network_forward(xs, w1s, b1s, w2s, b2s)
    jax.block_until_ready(outs)
    refs = _reference(xs, w1s, b1s, w2s, b2s)
    assert outs.shape == (Bs, Hs)
    assert jnp.allclose(outs, refs, atol=2e-2, rtol=2e-2), "case 2 mismatch"

    print("KERNEL_OK")
</pallas_src>

<mosaic_0001>
module attributes {stable_mosaic.version = 11 : i64} {
  func.func @_fused_linear_kernel(%arg0: i32, %arg1: i32, %arg2: i32, %arg3: memref<128x256xbf16, #tpu.memory_space<vmem>>, %arg4: memref<256x256xbf16, #tpu.memory_space<vmem>>, %arg5: memref<1x256xf32, #tpu.memory_space<vmem>>, %arg6: memref<128x256xf32, #tpu.memory_space<vmem>>, %arg7: memref<128x256xf32, #tpu.memory_space<vmem>>) attributes {dimension_semantics = [#tpu.dimension_semantics<parallel>, #tpu.dimension_semantics<parallel>, #tpu.dimension_semantics<arbitrary>], iteration_bounds = array<i64: 2, 1, 2>, scalar_prefetch = 0 : i64, scratch_operands = 1 : i64, tpu.core_type = #tpu.core_type<tc>, window_params = [{transform_indices = @transform_0, window_bounds = array<i64: 128, 256>}, {transform_indices = @transform_1, window_bounds = array<i64: 256, 256>}, {transform_indices = @transform_2, window_bounds = array<i64: 1, 256>}, {transform_indices = @transform_3, window_bounds = array<i64: 128, 256>}]} {
    %c0_i32 = arith.constant 0 : i32
    %0 = arith.cmpi eq, %arg2, %c0_i32 : i32
    %1 = arith.extui %0 : i1 to i32
    %c0_i32_0 = arith.constant 0 : i32
    %2 = arith.cmpi ne, %1, %c0_i32_0 : i32
    scf.if %2 {
      %cst_9 = arith.constant 0.000000e+00 : f32
      %12 = vector.broadcast %cst_9 : f32 to vector<128x256xf32>
      %c0_10 = arith.constant 0 : index
      %c0_11 = arith.constant 0 : index
      %13 = vector.load %arg7[%c0_10, %c0_11] : memref<128x256xf32, #tpu.memory_space<vmem>>, vector<128x256xf32>
      tpu.vector_store %arg7[%c0_10, %c0_11], %12 {strides = array<i32>} : memref<128x256xf32, #tpu.memory_space<vmem>>, vector<128x256xf32>,
    } else {
    }
    %c0 = arith.constant 0 : index
    %c0_1 = arith.constant 0 : index
    %3 = vector.load %arg7[%c0, %c0_1] : memref<128x256xf32, #tpu.memory_space<vmem>>, vector<128x256xf32>
    %c0_2 = arith.constant 0 : index
    %c0_3 = arith.constant 0 : index
    %4 = vector.load %arg3[%c0_2, %c0_3] : memref<128x256xbf16, #tpu.memory_space<vmem>>, vector<128x256xbf16>
    %c0_4 = arith.constant 0 : index
    %c0_5 = arith.constant 0 : index
    %5 = vector.load %arg4[%c0_4, %c0_5] : memref<256x256xbf16, #tpu.memory_space<vmem>>, vector<256x256xbf16>
    %cst = arith.constant dense<0.000000e+00> : vector<128x256xf32>
    %6 = tpu.matmul %4, %5, %cst {dimension_numbers = #tpu.dot_dimension_numbers<[1], [0], [0], [1], [0, 0, 1, 1], [], []>} : vector<128x256xbf16>, vector<256x256xbf16>, vector<128x256xf32> -> vector<128x256xf32>
    %7 = arith.addf %3, %6 : vector<128x256xf32>
    %c0_6 = arith.constant 0 : index
    %c0_7 = arith.constant 0 : index
    %8 = vector.load %arg7[%c0_6, %c0_7] : memref<128x256xf32, #tpu.memory_space<vmem>>, vector<128x256xf32>
    tpu.vector_store %arg7[%c0_6, %c0_7], %7 {strides = array<i32>} : memref<128x256xf32, #tpu.memory_space<vmem>>, vector<128x256xf32>,
    %c1_i32 = arith.constant 1 : i32
    %9 = arith.cmpi eq, %arg2, %c1_i32 : i32
    %10 = arith.extui %9 : i1 to i32
    %c0_i32_8 = arith.constant 0 : i32
    %11 = arith.cmpi ne, %10, %c0_i32_8 : i32
    scf.if %11 {
      %c0_9 = arith.constant 0 : index
      %c0_10 = arith.constant 0 : index
      %12 = vector.load %arg7[%c0_9, %c0_10] : memref<128x256xf32, #tpu.memory_space<vmem>>, vector<128x256xf32>
      %c0_11 = arith.constant 0 : index
      %c0_12 = arith.constant 0 : index
      %13 = vector.load %arg5[%c0_11, %c0_12] : memref<1x256xf32, #tpu.memory_space<vmem>>, vector<1x256xf32>
      %14 = vector.broadcast %13 : vector<1x256xf32> to vector<128x256xf32>
      %15 = arith.addf %12, %14 : vector<128x256xf32>
      %c0_13 = arith.constant 0 : index
      %c0_14 = arith.constant 0 : index
      %16 = vector.load %arg6[%c0_13, %c0_14] : memref<128x256xf32, #tpu.memory_space<vmem>>, vector<128x256xf32>
      tpu.vector_store %arg6[%c0_13, %c0_14], %15 {strides = array<i32>} : memref<128x256xf32, #tpu.memory_space<vmem>>, vector<128x256xf32>,
    } else {
    }
    return
  }
  func.func @transform_0(%arg0: i32, %arg1: i32, %arg2: i32) -> (i32, i32) {
    %c0_i32 = arith.constant 0 : i32
    return %arg0, %arg2 : i32, i32
  }
  func.func @transform_1(%arg0: i32, %arg1: i32, %arg2: i32) -> (i32, i32) {
    %c0_i32 = arith.constant 0 : i32
    return %arg2, %arg1 : i32, i32
  }
  func.func @transform_2(%arg0: i32, %arg1: i32, %arg2: i32) -> (i32, i32) {
    %c0_i32 = arith.constant 0 : i32
    %c0_i32_0 = arith.constant 0 : i32
    return %c0_i32, %arg1 : i32, i32
  }
  func.func @transform_3(%arg0: i32, %arg1: i32, %arg2: i32) -> (i32, i32) {
    %c0_i32 = arith.constant 0 : i32
    return %arg0, %arg1 : i32, i32
  }
}

</mosaic_0001>

<bundles_post_ra>
// kernel: network_forward.1
= control target key start
LH: loop header
LB: loop body
LE: loop exit
PB: predicated region body
PF: predicated region fallthrough
CT: control target
= control target key end

     0   :  { %s2060_s0 = inlined_call_operand.vmem [shape: bf16[256,512], index: 0, kind: input, shape index: {}]   ;;  %s2061_s1 = inlined_call_operand.vmem [shape: bf16[512,256], index: 1, kind: input, shape index: {}]   ;;  %s2062_s2 = inlined_call_operand.vmem [shape: f32[1,256], index: 2, kind: input, shape index: {}]   ;;  %s2063_s3 = inlined_call_operand.hbm [shape: f32[256,256], index: 3, kind: output, shape index: {}]  }
   0x1   :  { %2064 = sst [smem:[#allocation7_spill]] %s2060_s0 }
   0x2   :  { %8 = vsyncpa [#allocation5], 0 }
   0x3   :  { %10 = vsyncpa [#allocation5 + $0x1], 0  ;;  %s1707_s12 = smov 0   ;;  %s1709_s13 = smov 0  }
   0x4   :  { %s1711_s14 = smov 0   ;;  %s1713_s15 = smov 0  }
   0x5   :  { %s1715_s16 = smov 0   ;;  %s1717_s17 = smov 0  }
   0x6   :  { %s1719_s18 = smov 0   ;;  %s1721_s19 = smov 0  }
   0x7   :  { %s1723_s20 = smov 0   ;;  %s1725_s21 = smov 0  }
   0x8 LB: > { %s1214_s22 = sadd.s32 4294967295, %s1682_s21   ;;  %s1215_s23 = sadd.s32 4294967294, %s1682_s21   ;;  %s1682_s21 = sphi %s1725_s21, %s16_s21   ;;  %s1678_s20 = sphi %s1723_s20, %s2077_s20   ;;  %s1674_s19 = sphi %s1721_s19, %s2076_s19   ;;  %s1670_s18 = sphi %s1719_s18, %s2075_s18   ;;  %s1666_s17 = sphi %s1717_s17, %s2074_s17   ;;  %s1662_s16 = sphi %s1715_s16, %s2073_s16   ;;  %s1658_s15 = sphi %s1713_s15, %s2072_s15   ;;  %s1654_s14 = sphi %s1711_s14, %s2071_s14   ;;  %s1650_s13 = sphi %s1709_s13, %s2070_s13   ;;  %s1646_s12 = sphi %s1707_s12, %s2069_s12  }
   0x9   : > { %s28_s24 = sadd.s32 1, %s1674_s19  ;;  %s35_s25 = sadd.s32 1, %s1678_s20 }
   0xa   : > { %p29_p0 = scmp.ge.s32.totalorder %s28_s24, 2  ;;  %s44_s26 = sadd.s32 1, %s1662_s16 }
   0xb   : > { %p51_p1 = scmp.ne.s32.totalorder %s1662_s16, %s1658_s15  ;;  %p52_p2 = scmp.eq.s32.totalorder %s1682_s21, 0 }
   0xc   : > { %s2079_s24 = smov (%p29_p0, %s28_s24), 0  ;;  %s2081_s25 = smov (!%p29_p0, %s35_s25), %s1678_s20 }
   0xd   : > { %s40_s27 = ssub.s32 %s1674_s19, %s2079_s24  ;;  %p1770_p3 = por %p52_p2, %p51_p1 }
   0xe   : > { %p37_p4 = scmp.ge.s32.totalorder %s2081_s25, 2  ;;  %s126_s29 = sadd.s32 1, %s1654_s14 }
   0xf   : > { %p136_p5 = scmp.ne.s32.totalorder %s1654_s14, %s1650_s13  ;;  %p137_p6 = scmp.eq.s32.totalorder %s1214_s22, 3 }
  0x10   : > { %s2083_s25 = smov (%p37_p4, %s2081_s25), 0  ;;  %p142_p8 = scmp.ne.s32.totalorder %s1650_s13, %s1646_s12 }
  0x11   : > { %p1779_p7 = por %p137_p6, %p136_p5  ;;  %s39_s4 = ssub.s32 %s1678_s20, %s2083_s25 }
  0x12   : > { %p143_p9 = scmp.eq.s32.totalorder %s1215_s23, 3  ;;  %s41_s5 = sor.u32 %s40_s27, %s39_s4 }
  0x13   : > { %p124_p10 = scmp.eq.s32.totalorder %s39_s4, 0  ;;  %p42_p11 = scmp.eq.s32.totalorder %s41_s5, 0 }
  0x14   : > { %p1787_p12 = por %p143_p9, %p142_p8  ;;  %p1218_p13 = scmp.ge.s32.totalorder %s1682_s21, 4 }
  0x15   : > { %s1792_s7 = scalar_select %p124_p10, %s1654_s14, %s126_s29  }
  0x16   : > { %s1795_s8 = scalar_select %p42_p11, %s1662_s16, %s44_s26  }
  0x17   : > { %167 = sbr.rel (%p1218_p13) target bundleno = 54 (0x36), region = 20 }
  0x1c   : > { %170 = sbr.rel (!%p1770_p3) target bundleno = 54 (0x36), region = 24  ;;  %s172_s9 = sand.u32 (%p1770_p3), 1, %s1662_s16  }
  0x1d   : > { %s1221_s10 = sshll.u32 (%p1770_p3), %s1674_s19, 1  ;;  %s1219_s11 = sshll.u32 (%p1770_p3), %s172_s9, 7 }
  0x1e   : > { %s1430_s22 = sshll.u32 (%p1770_p3), %s1678_s20, 6  ;;  %s2068_s0 = sld [smem:[#allocation7_spill]] (%p1770_p3) }
  0x1f   : > { %s178_s23 = sadd.s32 (%p1770_p3), %s1430_s22, %s1221_s10  ;;  %s174_s28 = scalar_lea.vmem (%p1770_p3), [#allocation3], %s1219_s11 }
  0x20   : > { %s1223_s27 = sshll.u32 (%p1770_p3), %s178_s23, 2 }
  0x24   : > { %s1806_s26 = scalar_lea.vmem %s2068_s0, %s1223_s27 }
  0x25   : > { %v239_v0 = vld [vmem:[%s1806_s26] sm:$0xff]  ;;  %v241_v1 = vld [vmem:[%s1806_s26 + $0x10] sm:$0xff] }
  0x26   : > { %v243_v2 = vld [vmem:[%s1806_s26 + $0x20] sm:$0xff]  ;;  %240 = vst [vmem:[%s174_s28] sm:$0xff] %v239_v0  ;;  %v245_v3 = vld [vmem:[%s1806_s26 + $0x30] sm:$0xff] }
  0x27   : > { %242 = vst [vmem:[%s174_s28 + $0x8] sm:$0xff] %v241_v1  ;;  %v247_v4 = vld [vmem:[%s1806_s26 + $0x40] sm:$0xff]  ;;  %v249_v5 = vld [vmem:[%s1806_s26 + $0x50] sm:$0xff] }
  0x28   : > { %244 = vst [vmem:[%s174_s28 + $0x10] sm:$0xff] %v243_v2  ;;  %v251_v6 = vld [vmem:[%s1806_s26 + $0x60] sm:$0xff]  ;;  %v253_v7 = vld [vmem:[%s1806_s26 + $0x70] sm:$0xff] }
  0x29   : > { %246 = vst [vmem:[%s174_s28 + $0x18] sm:$0xff] %v245_v3  ;;  %v255_v8 = vld [vmem:[%s1806_s26 + $0x80] sm:$0xff]  ;;  %v257_v9 = vld [vmem:[%s1806_s26 + $0x90] sm:$0xff] }
  0x2a   : > { %248 = vst [vmem:[%s174_s28 + $0x20] sm:$0xff] %v247_v4  ;;  %v259_v10 = vld [vmem:[%s1806_s26 + $0xa0] sm:$0xff]  ;;  %v261_v11 = vld [vmem:[%s1806_s26 + $0xb0] sm:$0xff] }
  0x2b   : > { %250 = vst [vmem:[%s174_s28 + $0x28] sm:$0xff] %v249_v5  ;;  %v263_v12 = vld [vmem:[%s1806_s26 + $0xc0] sm:$0xff]  ;;  %v265_v13 = vld [vmem:[%s1806_s26 + $0xd0] sm:$0xff] }
  0x2c   : > { %252 = vst [vmem:[%s174_s28 + $0x30] sm:$0xff] %v251_v6  ;;  %v267_v14 = vld [vmem:[%s1806_s26 + $0xe0] sm:$0xff]  ;;  %v269_v15 = vld [vmem:[%s1806_s26 + $0xf0] sm:$0xff] }
  0x2d   : > { %254 = vst [vmem:[%s174_s28 + $0x38] sm:$0xff] %v253_v7 }
  0x2e   : > { %256 = vst [vmem:[%s174_s28 + $0x40] sm:$0xff] %v255_v8 }
  0x2f   : > { %258 = vst [vmem:[%s174_s28 + $0x48] sm:$0xff] %v257_v9 }
  0x30   : > { %260 = vst [vmem:[%s174_s28 + $0x50] sm:$0xff] %v259_v10 }
  0x31   : > { %262 = vst [vmem:[%s174_s28 + $0x58] sm:$0xff] %v261_v11 }
  0x32   : > { %264 = vst [vmem:[%s174_s28 + $0x60] sm:$0xff] %v263_v12 }
  0x33   : > { %266 = vst [vmem:[%s174_s28 + $0x68] sm:$0xff] %v265_v13 }
  0x34   : > { %268 = vst [vmem:[%s174_s28 + $0x70] sm:$0xff] %v267_v14 }
  0x35   : > { %270 = vst [vmem:[%s174_s28 + $0x78] sm:$0xff] %v269_v15 }
  0x36 PF: > { %p1224_p0 = scmp.ge.s32.totalorder %s1682_s21, 1  ;;  %p290_p1 = scmp.lt.s32.totalorder %s1682_s21, 5 }
  0x38   : > { %p291_p2 = pnand %p1224_p0, %p290_p1 }
  0x39   : > { %s297_s5 = sand.u32 (!%p291_p2), 1, %s1658_s15   ;;  %s331_s9 = sand.u32 (!%p291_p2), 1, %s1650_s13  }
  0x3a   : > { %294 = sbr.rel (%p291_p2) target bundleno = 447 (0x1bf), region = 66  ;;  %s1225_s10 = sshll.u32 (!%p291_p2), %s297_s5, 7 }
  0x3b   : > { %s1226_s11 = sshll.u32 (!%p291_p2), %s331_s9, 8  ;;  %s1227_s22 = sshll.u32 (!%p291_p2), %s1666_s17, 5 }
  0x3c   : > { %p338_p3 = scmp.lt.s32.totalorder (!%p291_p2), %s1227_s22, 63  ;;  %s1836_s26 = scalar_lea.vmem (!%p291_p2), [#allocation3], %s1225_s10 }
  0x3d   : > { %s1838_s28 = scalar_lea.vmem (!%p291_p2), [#allocation4], %s1226_s11  ;;  %p1230_p4 = scmp.ne.s32.totalorder (!%p291_p2), %s1666_s17, 0 }
  0x3f   : > { %s2085_s22 = smov (!%p338_p3, %s1227_s22), 63  ;;  %358 = sbr.rel (%p1230_p4) target bundleno = 101 (0x65), region = 74 }
  0x40   : > { %s1431_s23 = sshll.u32 %s2085_s22, 3 }
  0x41   : > { %s1834_s29 = scalar_lea.vmem %s2061_s1, %s1431_s23 }
  0x44   : > { %v1684_v16 = vmov 0.0  }
  0x45   : > { %359 = vst [vmem:[#allocation2 + $0xb0] sm:$0xff] %v1684_v16 }
  0x46   : > { %360 = vst [vmem:[#allocation2] sm:$0xff] %v1684_v16 }
  0x47   : > { %361 = vst [vmem:[#allocation2 + $0xd8] sm:$0xff] %v1684_v16 }
  0x48   : > { %362 = vst [vmem:[#allocation2 + $0x18] sm:$0xff] %v1684_v16 }
  0x49   : > { %363 = vst [vmem:[#allocation2 + $0x50] sm:$0xff] %v1684_v16 }
  0x4a   : > { %364 = vst [vmem:[#allocation2 + $0x68] sm:$0xff] %v1684_v16 }
  0x4b   : > { %365 = vst [vmem:[#allocation2 + $0x30] sm:$0xff] %v1684_v16 }
  0x4c   : > { %366 = vst [vmem:[#allocation2 + $0x48] sm:$0xff] %v1684_v16 }
  0x4d   : > { %367 = vst [vmem:[#allocation2 + $0x80] sm:$0xff] %v1684_v16 }
  0x4e   : > { %368 = vst [vmem:[#allocation2 + $0x88] sm:$0xff] %v1684_v16 }
  0x4f   : > { %369 = vst [vmem:[#allocation2 + $0xe8] sm:$0xff] %v1684_v16 }
  0x50   : > { %370 = vst [vmem:[#allocation2 + $0xb8] sm:$0xff] %v1684_v16 }
  0x51   : > { %371 = vst [vmem:[#allocation2 + $0x60] sm:$0xff] %v1684_v16 }
  0x52   : > { %372 = vst [vmem:[#allocation2 + $0xf0] sm:$0xff] %v1684_v16 }
  0x53   : > { %373 = vst [vmem:[#allocation2 + $0x8] sm:$0xff] %v1684_v16 }
  0x54   : > { %374 = vst [vmem:[#allocation2 + $0x78] sm:$0xff] %v1684_v16 }
  0x55   : > { %375 = vst [vmem:[#allocation2 + $0x38] sm:$0xff] %v1684_v16 }
  0x56   : > { %376 = vst [vmem:[#allocation2 + $0x58] sm:$0xff] %v1684_v16 }
  0x57   : > { %377 = vst [vmem:[#allocation2 + $0x40] sm:$0xff] %v1684_v16 }
  0x58   : > { %378 = vst [vmem:[#allocation2 + $0xc8] sm:$0xff] %v1684_v16 }
  0x59   : > { %379 = vst [vmem:[#allocation2 + $0xe0] sm:$0xff] %v1684_v16 }
  0x5a   : > { %380 = vst [vmem:[#allocation2 + $0x90] sm:$0xff] %v1684_v16 }
  0x5b   : > { %381 = vst [vmem:[#allocation2 + $0x70] sm:$0xff] %v1684_v16 }
  0x5c   : > { %382 = vst [vmem:[#allocation2 + $0xc0] sm:$0xff] %v1684_v16 }
  0x5d   : > { %383 = vst [vmem:[#allocation2 + $0xa8] sm:$0xff] %v1684_v16 }
  0x5e   : > { %384 = vst [vmem:[#allocation2 + $0xd0] sm:$0xff] %v1684_v16 }
  0x5f   : > { %385 = vst [vmem:[#allocation2 + $0x10] sm:$0xff] %v1684_v16 }
  0x60   : > { %386 = vst [vmem:[#allocation2 + $0x28] sm:$0xff] %v1684_v16 }
  0x61   : > { %387 = vst [vmem:[#allocation2 + $0xa0] sm:$0xff] %v1684_v16 }
  0x62   : > { %388 = vst [vmem:[#allocation2 + $0xf8] sm:$0xff] %v1684_v16 }
  0x63   : > { %389 = vst [vmem:[#allocation2 + $0x20] sm:$0xff] %v1684_v16 }
  0x64   : > { %390 = vst [vmem:[#allocation2 + $0x98] sm:$0xff] %v1684_v16 }
  0x65 PF: > { %v1353_v17 = vld [vmem:[%s1834_s29 + $0x70] sm:$0xf]  ;;  %v1463_v18 = vld [vmem:[%s1834_s29 + $0x74] sm:$0xf0]  ;;  %v1462_v22 = vld [vmem:[%s1834_s29 + $0x74] sm:$0xf] }
  0x66   : > { %v1417_v19 = vld [vmem:[%s1834_s29 + $0xf0] sm:$0xf]  ;;  %v1354_v20 = vor.u32 %v1463_v18, %v1353_v17  ;;  %v1479_v21 = vld [vmem:[%s1834_s29 + $0xf4] sm:$0xf0]  ;;  %v1355_v23 = vld [vmem:[%s1834_s29 + $0x78] sm:$0xf0] }
  0x67   : > { %v1418_v24 = vor.u32 %v1479_v21, %v1417_v19  ;;  %v1358_v25 = vor.u32 %v1462_v22, %v1355_v23  ;;  %v1478_v26 = vld [vmem:[%s1834_s29 + $0xf4] sm:$0xf]  ;;  %v1419_v27 = vld [vmem:[%s1834_s29 + $0xf8] sm:$0xf0]  ;;  %v1345_v28 = vld [vmem:[%s1834_s29 + $0x60] sm:$0xf] }
  0x68   : > { %711 = vmatpush.bf16.msra.mxu0 %v1354_v20  ;;  %v1422_v29 = vor.u32 %v1478_v26, %v1419_v27  ;;  %v1461_v30 = vld [vmem:[%s1834_s29 + $0x64] sm:$0xf0]  ;;  %v1409_v31 = vld [vmem:[%s1834_s29 + $0xe0] sm:$0xf]  ;;  %v1460_v35 = vld [vmem:[%s1834_s29 + $0x64] sm:$0xf] }
  0x69   : > { %v1477_v32 = vld [vmem:[%s1834_s29 + $0xe4] sm:$0xf0]  ;;  %760 = vmatpush.bf16.msra.mxu1 %v1418_v24  ;;  %809 = vmatpush.bf16.msra.mxu2 %v1358_v25  ;;  %v1346_v33 = vor.u32 %v1461_v30, %v1345_v28  ;;  %v1347_v36 = vld [vmem:[%s1834_s29 + $0x68] sm:$0xf0]  ;;  %v1476_v37 = vld [vmem:[%s1834_s29 + $0xe4] sm:$0xf] }
  0x6a   : > { %v1410_v34 = vor.u32 %v1477_v32, %v1409_v31  ;;  %858 = vmatpush.bf16.msra.mxu3 %v1422_v29  ;;  %v1350_v38 = vor.u32 %v1460_v35, %v1347_v36  ;;  %v1411_v39 = vld [vmem:[%s1834_s29 + $0xe8] sm:$0xf0]  ;;  %v1337_v40 = vld [vmem:[%s1834_s29 + $0x50] sm:$0xf]  ;;  %v1459_v41 = vld [vmem:[%s1834_s29 + $0x54] sm:$0xf0] }
  0x6b   : > { %v1414_v42 = vor.u32 %v1476_v37, %v1411_v39  ;;  %v1401_v43 = vld [vmem:[%s1834_s29 + $0xd0] sm:$0xf]  ;;  %v1475_v44 = vld [vmem:[%s1834_s29 + $0xd4] sm:$0xf0]  ;;  %v1458_v45 = vld [vmem:[%s1834_s29 + $0x54] sm:$0xf]  ;;  %v1338_v46 = vor.u32 %v1459_v41, %v1337_v40 }
  0x6c   : > { %712 = vmatpush.bf16.msra.mxu0 %v1346_v33  ;;  %v1339_v47 = vld [vmem:[%s1834_s29 + $0x58] sm:$0xf0]  ;;  %v1474_v48 = vld [vmem:[%s1834_s29 + $0xd4] sm:$0xf]  ;;  %v1402_v50 = vor.u32 %v1475_v44, %v1401_v43  ;;  %v1329_v52 = vld [vmem:[%s1834_s29 + $0x40] sm:$0xf] }
  0x6d   : > { %v1403_v49 = vld [vmem:[%s1834_s29 + $0xd8] sm:$0xf0]  ;;  %761 = vmatpush.bf16.msra.mxu1 %v1410_v34  ;;  %810 = vmatpush.bf16.msra.mxu2 %v1350_v38  ;;  %v1342_v51 = vor.u32 %v1458_v45, %v1339_v47  ;;  %v1457_v53 = vld [vmem:[%s1834_s29 + $0x44] sm:$0xf0]  ;;  %v1393_v54 = vld [vmem:[%s1834_s29 + $0xc0] sm:$0xf] }
  0x6e   : > { %859 = vmatpush.bf16.msra.mxu3 %v1414_v42  ;;  %v1406_v55 = vor.u32 %v1474_v48, %v1403_v49  ;;  %v1473_v56 = vld [vmem:[%s1834_s29 + $0xc4] sm:$0xf0]  ;;  %v1456_v57 = vld [vmem:[%s1834_s29 + $0x44] sm:$0xf]  ;;  %v1331_v58 = vld [vmem:[%s1834_s29 + $0x48] sm:$0xf0]  ;;  %v1330_v61 = vor.u32 %v1457_v53, %v1329_v52 }
  0x6f   : > { %v1472_v59 = vld [vmem:[%s1834_s29 + $0xc4] sm:$0xf]  ;;  %v1395_v60 = vld [vmem:[%s1834_s29 + $0xc8] sm:$0xf0]  ;;  %v1394_v62 = vor.u32 %v1473_v56, %v1393_v54  ;;  %v1334_v63 = vor.u32 %v1456_v57, %v1331_v58  ;;  %v1321_v0 = vld [vmem:[%s1834_s29 + $0x30] sm:$0xf] }
  0x70   : > { %713 = vmatpush.bf16.msra.mxu0 %v1338_v46  ;;  %v1455_v1 = vld [vmem:[%s1834_s29 + $0x34] sm:$0xf0]  ;;  %v1385_v2 = vld [vmem:[%s1834_s29 + $0xb0] sm:$0xf]  ;;  %v1398_v3 = vor.u32 %v1472_v59, %v1395_v60  ;;  %v1454_v5 = vld [vmem:[%s1834_s29 + $0x34] sm:$0xf] }
  0x71   : > { %762 = vmatpush.bf16.msra.mxu1 %v1402_v50  ;;  %811 = vmatpush.bf16.msra.mxu2 %v1342_v51  ;;  %v1471_v4 = vld [vmem:[%s1834_s29 + $0xb4] sm:$0xf0]  ;;  %v1323_v6 = vld [vmem:[%s1834_s29 + $0x38] sm:$0xf0]  ;;  %v1470_v7 = vld [vmem:[%s1834_s29 + $0xb4] sm:$0xf]  ;;  %v1322_v9 = vor.u32 %v1455_v1, %v1321_v0 }
  0x72   : > { %860 = vmatpush.bf16.msra.mxu3 %v1406_v55  ;;  %v1387_v8 = vld [vmem:[%s1834_s29 + $0xb8] sm:$0xf0]  ;;  %v1386_v10 = vor.u32 %v1471_v4, %v1385_v2  ;;  %v1326_v11 = vor.u32 %v1454_v5, %v1323_v6  ;;  %v1313_v12 = vld [vmem:[%s1834_s29 + $0x20] sm:$0xf]  ;;  %v1453_v13 = vld [vmem:[%s1834_s29 + $0x24] sm:$0xf0] }
  0x73   : > { %v1377_v14 = vld [vmem:[%s1834_s29 + $0xa0] sm:$0xf]  ;;  %v1390_v15 = vor.u32 %v1470_v7, %v1387_v8  ;;  %v1469_v16 = vld [vmem:[%s1834_s29 + $0xa4] sm:$0xf0]  ;;  %v1452_v17 = vld [vmem:[%s1834_s29 + $0x24] sm:$0xf]  ;;  %v1314_v21 = vor.u32 %v1453_v13, %v1313_v12 }
  0x74   : > { %714 = vmatpush.bf16.msra.mxu0 %v1330_v61  ;;  %v1315_v18 = vld [vmem:[%s1834_s29 + $0x28] sm:$0xf0]  ;;  %v1468_v19 = vld [vmem:[%s1834_s29 + $0xa4] sm:$0xf]  ;;  %v1378_v22 = vor.u32 %v1469_v16, %v1377_v14  ;;  %v1305_v24 = vld [vmem:[%s1834_s29 + $0x10] sm:$0xf] }
  0x75   : > { %763 = vmatpush.bf16.msra.mxu1 %v1394_v62  ;;  %812 = vmatpush.bf16.msra.mxu2 %v1334_v63  ;;  %v1379_v20 = vld [vmem:[%s1834_s29 + $0xa8] sm:$0xf0]  ;;  %v1318_v23 = vor.u32 %v1452_v17, %v1315_v18  ;;  %v1451_v25 = vld [vmem:[%s1834_s29 + $0x14] sm:$0xf0]  ;;  %v1369_v26 = vld [vmem:[%s1834_s29 + $0x90] sm:$0xf] }
  0x76   : > { %861 = vmatpush.bf16.msra.mxu3 %v1398_v3  ;;  %v1382_v27 = vor.u32 %v1468_v19, %v1379_v20  ;;  %v1467_v28 = vld [vmem:[%s1834_s29 + $0x94] sm:$0xf0]  ;;  %v1450_v29 = vld [vmem:[%s1834_s29 + $0x14] sm:$0xf]  ;;  %v1307_v30 = vld [vmem:[%s1834_s29 + $0x18] sm:$0xf0]  ;;  %v1306_v33 = vor.u32 %v1451_v25, %v1305_v24 }
  0x77   : > { %v1466_v31 = vld [vmem:[%s1834_s29 + $0x94] sm:$0xf]  ;;  %v1371_v32 = vld [vmem:[%s1834_s29 + $0x98] sm:$0xf0]  ;;  %v1370_v34 = vor.u32 %v1467_v28, %v1369_v26  ;;  %v1310_v35 = vor.u32 %v1450_v29, %v1307_v30  ;;  %v1297_v36 = vld [vmem:[%s1834_s29] sm:$0xf] }
  0x78   : > { %715 = vmatpush.bf16.msra.mxu0 %v1322_v9  ;;  %v1449_v37 = vld [vmem:[%s1834_s29 + $0x4] sm:$0xf0]  ;;  %v1361_v38 = vld [vmem:[%s1834_s29 + $0x80] sm:$0xf]  ;;  %v1374_v39 = vor.u32 %v1466_v31, %v1371_v32  ;;  %v1448_v41 = vld [vmem:[%s1834_s29 + $0x4] sm:$0xf] }
  0x79   : > { %764 = vmatpush.bf16.msra.mxu1 %v1386_v10  ;;  %813 = vmatpush.bf16.msra.mxu2 %v1326_v11  ;;  %v1465_v40 = vld [vmem:[%s1834_s29 + $0x84] sm:$0xf0]  ;;  %v1299_v42 = vld [vmem:[%s1834_s29 + $0x8] sm:$0xf0]  ;;  %v1464_v43 = vld [vmem:[%s1834_s29 + $0x84] sm:$0xf]  ;;  %v1298_v45 = vor.u32 %v1449_v37, %v1297_v36 }
  0x7a   : > { %862 = vmatpush.bf16.msra.mxu3 %v1390_v15  ;;  %v1363_v44 = vld [vmem:[%s1834_s29 + $0x88] sm:$0xf0]  ;;  %v1233_v46 = vld [vmem:[%s1836_s26] sm:$0xf]  ;;  %v1433_v47 = vld [vmem:[%s1836_s26 + $0x4] sm:$0xf0]  ;;  %v1362_v48 = vor.u32 %v1465_v40, %v1361_v38  ;;  %v1302_v49 = vor.u32 %v1448_v41, %v1299_v42 }
  0x7b   : > { %v1432_v50 = vld [vmem:[%s1836_s26 + $0x4] sm:$0xf]  ;;  %v1235_v51 = vld [vmem:[%s1836_s26 + $0x8] sm:$0xf0]  ;;  %v1366_v52 = vor.u32 %v1464_v43, %v1363_v44  ;;  %v1234_v53 = vor.u32 %v1433_v47, %v1233_v46  ;;  %v1241_v55 = vld [vmem:[%s1836_s26 + $0x10] sm:$0xf] }
  0x7c   : > { %716 = vmatpush.bf16.msra.mxu0 %v1314_v21  ;;  %v1238_v54 = vor.u32 %v1432_v50, %v1235_v51  ;;  %v1435_v56 = vld [vmem:[%s1836_s26 + $0x14] sm:$0xf0]  ;;  %v1434_v57 = vld [vmem:[%s1836_s26 + $0x14] sm:$0xf]  ;;  %v1243_v58 = vld [vmem:[%s1836_s26 + $0x18] sm:$0xf0] }
  0x7d   : > { %765 = vmatpush.bf16.msra.mxu1 %v1378_v22  ;;  %814 = vmatpush.bf16.msra.mxu2 %v1318_v23  ;;  %v1242_v59 = vor.u32 %v1435_v56, %v1241_v55  ;;  %v1246_v60 = vor.u32 %v1434_v57, %v1243_v58  ;;  %v1249_v61 = vld [vmem:[%s1836_s26 + $0x20] sm:$0xf]  ;;  %v1437_v62 = vld [vmem:[%s1836_s26 + $0x24] sm:$0xf0]  ;;  %v1436_v63 = vld [vmem:[%s1836_s26 + $0x24] sm:$0xf] }
  0x7e   : > { %863 = vmatpush.bf16.msra.mxu3 %v1382_v27  ;;  %v1251_v0 = vld [vmem:[%s1836_s26 + $0x28] sm:$0xf0]  ;;  %v1250_v1 = vor.u32 %v1437_v62, %v1249_v61  ;;  %v1257_v3 = vld [vmem:[%s1836_s26 + $0x30] sm:$0xf]  ;;  %v1439_v4 = vld [vmem:[%s1836_s26 + $0x34] sm:$0xf0] }
  0x7f   : > { %v1254_v2 = vor.u32 %v1436_v63, %v1251_v0  ;;  %v1438_v5 = vld [vmem:[%s1836_s26 + $0x34] sm:$0xf]  ;;  %v1259_v6 = vld [vmem:[%s1836_s26 + $0x38] sm:$0xf0]  ;;  %v1258_v7 = vor.u32 %v1439_v4, %v1257_v3  ;;  %v1265_v9 = vld [vmem:[%s1836_s26 + $0x40] sm:$0xf] }
  0x80   : > { %717 = vmatpush.bf16.msra.mxu0 %v1306_v33  ;;  %v1262_v8 = vor.u32 %v1438_v5, %v1259_v6  ;;  %v1441_v10 = vld [vmem:[%s1836_s26 + $0x44] sm:$0xf0]  ;;  %v1440_v11 = vld [vmem:[%s1836_s26 + $0x44] sm:$0xf]  ;;  %v1267_v12 = vld [vmem:[%s1836_s26 + $0x48] sm:$0xf0] }
  0x81   : > { %766 = vmatpush.bf16.msra.mxu1 %v1370_v34  ;;  %815 = vmatpush.bf16.msra.mxu2 %v1310_v35  ;;  %v1266_v13 = vor.u32 %v1441_v10, %v1265_v9  ;;  %v1270_v14 = vor.u32 %v1440_v11, %v1267_v12  ;;  %v1273_v15 = vld [vmem:[%s1836_s26 + $0x50] sm:$0xf]  ;;  %v1443_v16 = vld [vmem:[%s1836_s26 + $0x54] sm:$0xf0]  ;;  %v1442_v17 = vld [vmem:[%s1836_s26 + $0x54] sm:$0xf] }
  0x82   : > { %864 = vmatpush.bf16.msra.mxu3 %v1374_v39  ;;  %v1275_v18 = vld [vmem:[%s1836_s26 + $0x58] sm:$0xf0]  ;;  %v1274_v19 = vor.u32 %v1443_v16, %v1273_v15  ;;  %v1281_v21 = vld [vmem:[%s1836_s26 + $0x60] sm:$0xf]  ;;  %v1445_v22 = vld [vmem:[%s1836_s26 + $0x64] sm:$0xf0] }
  0x83   : > { %v1278_v20 = vor.u32 %v1442_v17, %v1275_v18  ;;  %v1444_v23 = vld [vmem:[%s1836_s26 + $0x64] sm:$0xf]  ;;  %v1283_v24 = vld [vmem:[%s1836_s26 + $0x68] sm:$0xf0]  ;;  %v1282_v25 = vor.u32 %v1445_v22, %v1281_v21  ;;  %v1289_v27 = vld [vmem:[%s1836_s26 + $0x70] sm:$0xf] }
  0x84   : > { %718 = vmatpush.bf16.msra.mxu0 %v1298_v45  ;;  %v1286_v26 = vor.u32 %v1444_v23, %v1283_v24  ;;  %v1447_v28 = vld [vmem:[%s1836_s26 + $0x74] sm:$0xf0]  ;;  %v1446_v29 = vld [vmem:[%s1836_s26 + $0x74] sm:$0xf]  ;;  %v1291_v30 = vld [vmem:[%s1836_s26 + $0x78] sm:$0xf0] }
  0x85   : > { %767 = vmatpush.bf16.msra.mxu1 %v1362_v48  ;;  %816 = vmatpush.bf16.msra.mxu2 %v1302_v49  ;;  %v1290_v31 = vor.u32 %v1447_v28, %v1289_v27  ;;  %v1294_v32 = vor.u32 %v1446_v29, %v1291_v30  ;;  %v391_v34 = vld [vmem:[#allocation2 + $0xb0] sm:$0xff]  ;;  %v392_v39 = vld [vmem:[#allocation2] sm:$0xff]  ;;  %v393_v43 = vld [vmem:[#allocation2 + $0xd8] sm:$0xff]  ;;  %p1423_p5 = scmp.ne.s32.totalorder %s1666_s17, 1 }
  0x86   : > { %865 = vmatpush.bf16.msra.mxu3 %v1366_v52  ;;  %v394_v49 = vld [vmem:[#allocation2 + $0x18] sm:$0xff]  ;;  %v397_v63 = vld [vmem:[#allocation2 + $0x30] sm:$0xff]  ;;  %v398_v5 = vld [vmem:[#allocation2 + $0x48] sm:$0xff] }
  0x87   : > { %719 = vmatmul.bf16.vlgmr.msra.gmra.mxu0 %v1234_v53  ;;  %v399_v9 = vld [vmem:[#allocation2 + $0x80] sm:$0xff]  ;;  %v400_v15 = vld [vmem:[#allocation2 + $0x88] sm:$0xff] }
  0x88   : > { %768 = vmatmul.bf16.vlgmr.msra.gmra.mxu1 %v1238_v54  ;;  %817 = vmatmul.bf16.vlgmr.msra.gmra.mxu2 %v1234_v53  ;;  %v395_v53 = vld [vmem:[#allocation2 + $0x50] sm:$0xff]  ;;  %v403_v29 = vld [vmem:[#allocation2 + $0x60] sm:$0xff] }
  0x89   : > { %866 = vmatmul.bf16.vlgmr.msra.gmra.mxu3 %v1238_v54 }
  0x97   : > { %724 = vmatmul.bf16.gmra.mxu0 %v1242_v59 }
  0x98   : > { %773 = vmatmul.bf16.gmra.mxu1 %v1246_v60  ;;  %822 = vmatmul.bf16.gmra.mxu2 %v1242_v59  ;;  %v396_v59 = vld [vmem:[#allocation2 + $0x68] sm:$0xff] }
  0x99   : > { %871 = vmatmul.bf16.gmra.mxu3 %v1246_v60 }
  0xa7   : > { %729 = vmatmul.bf16.gmra.mxu0 %v1250_v1 }
  0xa8   : > { %778 = vmatmul.bf16.gmra.mxu1 %v1254_v2  ;;  %827 = vmatmul.bf16.gmra.mxu2 %v1250_v1 }
  0xa9   : > { %876 = vmatmul.bf16.gmra.mxu3 %v1254_v2 }
  0xb7   : > { %734 = vmatmul.bf16.gmra.mxu0 %v1258_v7 }
  0xb8   : > { %783 = vmatmul.bf16.gmra.mxu1 %v1262_v8  ;;  %832 = vmatmul.bf16.gmra.mxu2 %v1258_v7 }
  0xb9   : > { %881 = vmatmul.bf16.gmra.mxu3 %v1262_v8 }
  0xc7   : > { %739 = vmatmul.bf16.gmra.mxu0 %v1266_v13 }
  0xc8   : > { %788 = vmatmul.bf16.gmra.mxu1 %v1270_v14  ;;  %837 = vmatmul.bf16.gmra.mxu2 %v1266_v13 }
  0xc9   : > { %886 = vmatmul.bf16.gmra.mxu3 %v1270_v14 }
  0xd7   : > { %744 = vmatmul.bf16.gmra.mxu0 %v1274_v19 }
  0xd8   : > { %793 = vmatmul.bf16.gmra.mxu1 %v1278_v20  ;;  %842 = vmatmul.bf16.gmra.mxu2 %v1274_v19  ;;  %v401_v19 = vld [vmem:[#allocation2 + $0xe8] sm:$0xff] }
  0xd9   : > { %891 = vmatmul.bf16.gmra.mxu3 %v1278_v20 }
  0xe7   : > { %749 = vmatmul.bf16.gmra.mxu0 %v1282_v25 }
  0xe8   : > { %798 = vmatmul.bf16.gmra.mxu1 %v1286_v26  ;;  %847 = vmatmul.bf16.gmra.mxu2 %v1282_v25  ;;  %v402_v25 = vld [vmem:[#allocation2 + $0xb8] sm:$0xff] }
  0xe9   : > { %896 = vmatmul.bf16.gmra.mxu3 %v1286_v26 }
  0xf7   : > { %754 = vmatmul.bf16.gmra.mxu0 %v1290_v31 }
  0xf8   : > { %803 = vmatmul.bf16.gmra.mxu1 %v1294_v32  ;;  %852 = vmatmul.bf16.gmra.mxu2 %v1290_v31 }
  0xf9   : > { %901 = vmatmul.bf16.gmra.mxu3 %v1294_v32 }
 0x104   : > { %v720_v33 = vpop.f32.mrf.mxu0 }
 0x105   : > { %v769_v35 = vpop.f32.mrf.mxu1 }
 0x106   : > { %v770_v36 = vadd.f32 %v769_v35, %v720_v33  ;;  %v404_v35 = vld [vmem:[#allocation2 + $0xf0] sm:$0xff] }
 0x108   : > { %v907_v37 = vadd.f32 %v770_v36, %v391_v34 }
 0x10a   : > { %939 = vst [vmem:[#allocation2 + $0xb0] sm:$0xff] %v907_v37 }
 0x10b   : > { %v818_v38 = vpop.f32.mrf.mxu2 }
 0x10c   : > { %v867_v40 = vpop.f32.mrf.mxu3  ;;  %v722_v41 = vpop.f32.mrf.mxu0 }
 0x10d   : > { %v868_v42 = vadd.f32 %v867_v40, %v818_v38  ;;  %v771_v44 = vpop.f32.mrf.mxu1 }
 0x10e   : > { %v772_v45 = vadd.f32 %v771_v44, %v722_v41 }
 0x10f   : > { %v908_v46 = vadd.f32 %v868_v42, %v392_v39  ;;  %v405_v39 = vld [vmem:[#allocation2 + $0x8] sm:$0xff] }
 0x110   : > { %v909_v47 = vadd.f32 %v772_v45, %v393_v43  ;;  %v406_v45 = vld [vmem:[#allocation2 + $0x78] sm:$0xff] }
 0x111   : > { %940 = vst [vmem:[#allocation2] sm:$0xff] %v908_v46 }
 0x112   : > { %941 = vst [vmem:[#allocation2 + $0xd8] sm:$0xff] %v909_v47 }
 0x113   : > { %v820_v48 = vpop.f32.mrf.mxu2 }
 0x114   : > { %v869_v50 = vpop.f32.mrf.mxu3  ;;  %v725_v51 = vpop.f32.mrf.mxu0 }
 0x115   : > { %v870_v52 = vadd.f32 %v869_v50, %v820_v48  ;;  %v774_v54 = vpop.f32.mrf.mxu1 }
 0x116   : > { %v775_v55 = vadd.f32 %v774_v54, %v725_v51 }
 0x117   : > { %v910_v56 = vadd.f32 %v870_v52, %v394_v49  ;;  %v407_v49 = vld [vmem:[#allocation2 + $0x38] sm:$0xff] }
 0x118   : > { %v911_v57 = vadd.f32 %v775_v55, %v395_v53  ;;  %v408_v55 = vld [vmem:[#allocation2 + $0x58] sm:$0xff] }
 0x119   : > { %942 = vst [vmem:[#allocation2 + $0x18] sm:$0xff] %v910_v56 }
 0x11a   : > { %943 = vst [vmem:[#allocation2 + $0x50] sm:$0xff] %v911_v57 }
 0x11b   : > { %v823_v58 = vpop.f32.mrf.mxu2 }
 0x11c   : > { %v872_v60 = vpop.f32.mrf.mxu3  ;;  %v727_v61 = vpop.f32.mrf.mxu0 }
 0x11d   : > { %v873_v62 = vadd.f32 %v872_v60, %v823_v58  ;;  %v776_v0 = vpop.f32.mrf.mxu1 }
 0x11e   : > { %v777_v1 = vadd.f32 %v776_v0, %v727_v61 }
 0x11f   : > { %v912_v2 = vadd.f32 %v873_v62, %v396_v59  ;;  %v409_v59 = vld [vmem:[#allocation2 + $0x40] sm:$0xff] }
 0x120   : > { %v913_v3 = vadd.f32 %v777_v1, %v397_v63  ;;  %v410_v1 = vld [vmem:[#allocation2 + $0xc8] sm:$0xff] }
 0x121   : > { %944 = vst [vmem:[#allocation2 + $0x68] sm:$0xff] %v912_v2 }
 0x122   : > { %945 = vst [vmem:[#allocation2 + $0x30] sm:$0xff] %v913_v3 }
 0x123   : > { %v825_v4 = vpop.f32.mrf.mxu2 }
 0x124   : > { %v874_v6 = vpop.f32.mrf.mxu3  ;;  %v730_v7 = vpop.f32.mrf.mxu0 }
 0x125   : > { %v875_v8 = vadd.f32 %v874_v6, %v825_v4  ;;  %v779_v10 = vpop.f32.mrf.mxu1 }
 0x126   : > { %v780_v11 = vadd.f32 %v779_v10, %v730_v7 }
 0x127   : > { %v914_v12 = vadd.f32 %v875_v8, %v398_v5  ;;  %v411_v5 = vld [vmem:[#allocation2 + $0xe0] sm:$0xff] }
 0x128   : > { %v915_v13 = vadd.f32 %v780_v11, %v399_v9  ;;  %v412_v11 = vld [vmem:[#allocation2 + $0x90] sm:$0xff] }
 0x129   : > { %946 = vst [vmem:[#allocation2 + $0x48] sm:$0xff] %v914_v12 }
 0x12a   : > { %947 = vst [vmem:[#allocation2 + $0x80] sm:$0xff] %v915_v13 }
 0x12b   : > { %v828_v14 = vpop.f32.mrf.mxu2 }
 0x12c   : > { %v877_v16 = vpop.f32.mrf.mxu3  ;;  %v732_v17 = vpop.f32.mrf.mxu0 }
 0x12d   : > { %v878_v18 = vadd.f32 %v877_v16, %v828_v14  ;;  %v781_v20 = vpop.f32.mrf.mxu1 }
 0x12e   : > { %v782_v21 = vadd.f32 %v781_v20, %v732_v17 }
 0x12f   : > { %v916_v22 = vadd.f32 %v878_v18, %v400_v15  ;;  %v413_v15 = vld [vmem:[#allocation2 + $0x70] sm:$0xff] }
 0x130   : > { %v917_v23 = vadd.f32 %v782_v21, %v401_v19  ;;  %v414_v21 = vld [vmem:[#allocation2 + $0xc0] sm:$0xff] }
 0x131   : > { %948 = vst [vmem:[#allocation2 + $0x88] sm:$0xff] %v916_v22 }
 0x132   : > { %949 = vst [vmem:[#allocation2 + $0xe8] sm:$0xff] %v917_v23 }
 0x133   : > { %v830_v24 = vpop.f32.mrf.mxu2 }
 0x134   : > { %v879_v26 = vpop.f32.mrf.mxu3  ;;  %v735_v27 = vpop.f32.mrf.mxu0 }
 0x135   : > { %v880_v28 = vadd.f32 %v879_v26, %v830_v24  ;;  %v784_v30 = vpop.f32.mrf.mxu1 }
 0x136   : > { %v785_v31 = vadd.f32 %v784_v30, %v735_v27 }
 0x137   : > { %v918_v32 = vadd.f32 %v880_v28, %v402_v25  ;;  %v415_v25 = vld [vmem:[#allocation2 + $0xa8] sm:$0xff] }
 0x138   : > { %v919_v33 = vadd.f32 %v785_v31, %v403_v29  ;;  %v416_v31 = vld [vmem:[#allocation2 + $0xd0] sm:$0xff] }
 0x139   : > { %950 = vst [vmem:[#allocation2 + $0xb8] sm:$0xff] %v918_v32 }
 0x13a   : > { %951 = vst [vmem:[#allocation2 + $0x60] sm:$0xff] %v919_v33 }
 0x13b   : > { %v833_v34 = vpop.f32.mrf.mxu2 }
 0x13c   : > { %v882_v36 = vpop.f32.mrf.mxu3  ;;  %v737_v37 = vpop.f32.mrf.mxu0 }
 0x13d   : > { %v883_v38 = vadd.f32 %v882_v36, %v833_v34  ;;  %v786_v40 = vpop.f32.mrf.mxu1 }
 0x13e   : > { %v787_v41 = vadd.f32 %v786_v40, %v737_v37 }
 0x13f   : > { %v920_v42 = vadd.f32 %v883_v38, %v404_v35  ;;  %v417_v35 = vld [vmem:[#allocation2 + $0x10] sm:$0xff] }
 0x140   : > { %v921_v43 = vadd.f32 %v787_v41, %v405_v39  ;;  %v418_v41 = vld [vmem:[#allocation2 + $0x28] sm:$0xff] }
 0x141   : > { %952 = vst [vmem:[#allocation2 + $0xf0] sm:$0xff] %v920_v42 }
 0x142   : > { %953 = vst [vmem:[#allocation2 + $0x8] sm:$0xff] %v921_v43 }
 0x143   : > { %v835_v44 = vpop.f32.mrf.mxu2 }
 0x144   : > { %v884_v46 = vpop.f32.mrf.mxu3  ;;  %v740_v47 = vpop.f32.mrf.mxu0 }
 0x145   : > { %v885_v48 = vadd.f32 %v884_v46, %v835_v44  ;;  %v789_v50 = vpop.f32.mrf.mxu1 }
 0x146   : > { %v790_v51 = vadd.f32 %v789_v50, %v740_v47 }
 0x147   : > { %v922_v52 = vadd.f32 %v885_v48, %v406_v45  ;;  %v419_v45 = vld [vmem:[#allocation2 + $0xa0] sm:$0xff] }
 0x148   : > { %v923_v53 = vadd.f32 %v790_v51, %v407_v49  ;;  %v420_v51 = vld [vmem:[#allocation2 + $0xf8] sm:$0xff] }
 0x149   : > { %954 = vst [vmem:[#allocation2 + $0x78] sm:$0xff] %v922_v52 }
 0x14a   : > { %955 = vst [vmem:[#allocation2 + $0x38] sm:$0xff] %v923_v53 }
 0x14b   : > { %v838_v54 = vpop.f32.mrf.mxu2 }
 0x14c   : > { %v887_v56 = vpop.f32.mrf.mxu3  ;;  %v742_v57 = vpop.f32.mrf.mxu0 }
 0x14d   : > { %v888_v58 = vadd.f32 %v887_v56, %v838_v54  ;;  %v791_v60 = vpop.f32.mrf.mxu1 }
 0x14e   : > { %v792_v61 = vadd.f32 %v791_v60, %v742_v57 }
 0x14f   : > { %v924_v62 = vadd.f32 %v888_v58, %v408_v55  ;;  %v421_v55 = vld [vmem:[#allocation2 + $0x20] sm:$0xff] }
 0x150   : > { %v925_v63 = vadd.f32 %v792_v61, %v409_v59  ;;  %v422_v61 = vld [vmem:[#allocation2 + $0x98] sm:$0xff] }
 0x151   : > { %956 = vst [vmem:[#allocation2 + $0x58] sm:$0xff] %v924_v62 }
 0x152   : > { %957 = vst [vmem:[#allocation2 + $0x40] sm:$0xff] %v925_v63 }
 0x153   : > { %v840_v0 = vpop.f32.mrf.mxu2 }
 0x154   : > { %v889_v2 = vpop.f32.mrf.mxu3  ;;  %v745_v3 = vpop.f32.mrf.mxu0 }
 0x155   : > { %v890_v4 = vadd.f32 %v889_v2, %v840_v0  ;;  %v794_v6 = vpop.f32.mrf.mxu1 }
 0x156   : > { %v795_v7 = vadd.f32 %v794_v6, %v745_v3 }
 0x157   : > { %v926_v8 = vadd.f32 %v890_v4, %v410_v1 }
 0x158   : > { %v927_v9 = vadd.f32 %v795_v7, %v411_v5 }
 0x159   : > { %958 = vst [vmem:[#allocation2 + $0xc8] sm:$0xff] %v926_v8 }
 0x15a   : > { %959 = vst [vmem:[#allocation2 + $0xe0] sm:$0xff] %v927_v9 }
 0x15b   : > { %v843_v10 = vpop.f32.mrf.mxu2 }
 0x15c   : > { %v892_v12 = vpop.f32.mrf.mxu3  ;;  %v747_v13 = vpop.f32.mrf.mxu0 }
 0x15d   : > { %v893_v14 = vadd.f32 %v892_v12, %v843_v10  ;;  %v796_v16 = vpop.f32.mrf.mxu1 }
 0x15e   : > { %v797_v17 = vadd.f32 %v796_v16, %v747_v13 }
 0x15f   : > { %v928_v18 = vadd.f32 %v893_v14, %v412_v11 }
 0x160   : > { %v929_v19 = vadd.f32 %v797_v17, %v413_v15 }
 0x161   : > { %960 = vst [vmem:[#allocation2 + $0x90] sm:$0xff] %v928_v18 }
 0x162   : > { %961 = vst [vmem:[#allocation2 + $0x70] sm:$0xff] %v929_v19 }
 0x163   : > { %v845_v20 = vpop.f32.mrf.mxu2 }
 0x164   : > { %v894_v22 = vpop.f32.mrf.mxu3  ;;  %v750_v23 = vpop.f32.mrf.mxu0 }
 0x165   : > { %v895_v24 = vadd.f32 %v894_v22, %v845_v20  ;;  %v799_v26 = vpop.f32.mrf.mxu1 }
 0x166   : > { %v800_v27 = vadd.f32 %v799_v26, %v750_v23 }
 0x167   : > { %v930_v28 = vadd.f32 %v895_v24, %v414_v21 }
 0x168   : > { %v931_v29 = vadd.f32 %v800_v27, %v415_v25 }
 0x169   : > { %962 = vst [vmem:[#allocation2 + $0xc0] sm:$0xff] %v930_v28 }
 0x16a   : > { %963 = vst [vmem:[#allocation2 + $0xa8] sm:$0xff] %v931_v29 }
 0x16b   : > { %v848_v30 = vpop.f32.mrf.mxu2 }
 0x16c   : > { %v897_v32 = vpop.f32.mrf.mxu3  ;;  %v752_v33 = vpop.f32.mrf.mxu0 }
 0x16d   : > { %v898_v34 = vadd.f32 %v897_v32, %v848_v30  ;;  %v801_v36 = vpop.f32.mrf.mxu1 }
 0x16e   : > { %v802_v37 = vadd.f32 %v801_v36, %v752_v33 }
 0x16f   : > { %v932_v38 = vadd.f32 %v898_v34, %v416_v31 }
 0x170   : > { %v933_v39 = vadd.f32 %v802_v37, %v417_v35 }
 0x171   : > { %964 = vst [vmem:[#allocation2 + $0xd0] sm:$0xff] %v932_v38 }
 0x172   : > { %965 = vst [vmem:[#allocation2 + $0x10] sm:$0xff] %v933_v39 }
 0x173   : > { %v850_v40 = vpop.f32.mrf.mxu2 }
 0x174   : > { %v899_v42 = vpop.f32.mrf.mxu3  ;;  %v755_v43 = vpop.f32.mrf.mxu0 }
 0x175   : > { %v900_v44 = vadd.f32 %v899_v42, %v850_v40  ;;  %v804_v46 = vpop.f32.mrf.mxu1 }
 0x176   : > { %v805_v47 = vadd.f32 %v804_v46, %v755_v43 }
 0x177   : > { %v934_v48 = vadd.f32 %v900_v44, %v418_v41 }
 0x178   : > { %v935_v49 = vadd.f32 %v805_v47, %v419_v45 }
 0x179   : > { %966 = vst [vmem:[#allocation2 + $0x28] sm:$0xff] %v934_v48 }
 0x17a   : > { %967 = vst [vmem:[#allocation2 + $0xa0] sm:$0xff] %v935_v49 }
 0x17b   : > { %v853_v50 = vpop.f32.mrf.mxu2 }
 0x17c   : > { %v902_v52 = vpop.f32.mrf.mxu3  ;;  %v757_v53 = vpop.f32.mrf.mxu0 }
 0x17d   : > { %v903_v54 = vadd.f32 %v902_v52, %v853_v50  ;;  %v806_v56 = vpop.f32.mrf.mxu1 }
 0x17e   : > { %v807_v57 = vadd.f32 %v806_v56, %v757_v53 }
 0x17f   : > { %v936_v58 = vadd.f32 %v903_v54, %v420_v51 }
 0x180   : > { %v937_v59 = vadd.f32 %v807_v57, %v421_v55 }
 0x181   : > { %968 = vst [vmem:[#allocation2 + $0xf8] sm:$0xff] %v936_v58 }
 0x182   : > { %969 = vst [vmem:[#allocation2 + $0x20] sm:$0xff] %v937_v59 }
 0x183   : > { %v855_v60 = vpop.f32.mrf.mxu2 }
 0x184   : > { %v904_v62 = vpop.f32.mrf.mxu3 }
 0x185   : > { %v905_v63 = vadd.f32 %v904_v62, %v855_v60  ;;  %974 = sbr.rel (%p1423_p5) target bundleno = 431 (0x1af), region = 78 }
 0x187   : > { %v938_v0 = vadd.f32 %v905_v63, %v422_v61 }
 0x189   : > { %970 = vst [vmem:[#allocation2 + $0x98] sm:$0xff] %v938_v0 }
 0x18a   : > { %v975_v1 = vld [vmem:[#allocation2 + $0xb0] sm:$0xff]  ;;  %v1007_v2 = vld [vmem:[%s2062_s2] sm:$0x3]  ;;  %v977_v6 = vld [vmem:[#allocation2 + $0xd8] sm:$0xff] }
 0x18b   : > { %v976_v3 = vld [vmem:[#allocation2] sm:$0xff]  ;;  %v1941_v4 = vperm.slane %v1007_v2, 0  ;;  %v1943_v5 = vperm.slane %v1007_v2, 1  ;;  %v978_v7 = vld [vmem:[#allocation2 + $0x18] sm:$0xff]  ;;  %v979_v8 = vld [vmem:[#allocation2 + $0x50] sm:$0xff] }
 0x18c   : > { %v980_v12 = vld [vmem:[#allocation2 + $0x68] sm:$0xff]  ;;  %v981_v14 = vld [vmem:[#allocation2 + $0x30] sm:$0xff]  ;;  %v983_v18 = vld [vmem:[#allocation2 + $0x80] sm:$0xff] }
 0x18d   : > { %v1013_v9 = vadd.f32 %v1941_v4, %v975_v1  ;;  %v1014_v10 = vadd.f32 %v1943_v5, %v976_v3  ;;  %v1015_v11 = vadd.f32 %v1941_v4, %v977_v6  ;;  %v1016_v13 = vadd.f32 %v1943_v5, %v978_v7  ;;  %v982_v16 = vld [vmem:[#allocation2 + $0x48] sm:$0xff]  ;;  %v986_v24 = vld [vmem:[#allocation2 + $0xb8] sm:$0xff]  ;;  %v987_v26 = vld [vmem:[#allocation2 + $0x60] sm:$0xff] }
 0x18e   : > { %v1017_v15 = vadd.f32 %v1941_v4, %v979_v8  ;;  %v1018_v17 = vadd.f32 %v1943_v5, %v980_v12  ;;  %v1019_v19 = vadd.f32 %v1941_v4, %v981_v14  ;;  %v984_v20 = vld [vmem:[#allocation2 + $0x88] sm:$0xff]  ;;  %v1020_v21 = vadd.f32 %v1943_v5, %v982_v16  ;;  %v988_v28 = vld [vmem:[#allocation2 + $0xf0] sm:$0xff]  ;;  %v990_v32 = vld [vmem:[#allocation2 + $0x78] sm:$0xff] }
 0x18f   : > { %1045 = vst [vmem:[%s1838_s28] sm:$0xff] %v1013_v9  ;;  %v985_v22 = vld [vmem:[#allocation2 + $0xe8] sm:$0xff]  ;;  %v1021_v23 = vadd.f32 %v1941_v4, %v983_v18  ;;  %v1022_v25 = vadd.f32 %v1943_v5, %v984_v20  ;;  %v1024_v29 = vadd.f32 %v1943_v5, %v986_v24  ;;  %v1025_v31 = vadd.f32 %v1941_v4, %v987_v26  ;;  %v991_v34 = vld [vmem:[#allocation2 + $0x38] sm:$0xff]  ;;  %v993_v38 = vld [vmem:[#allocation2 + $0x40] sm:$0xff] }
 0x190   : > { %1046 = vst [vmem:[%s1838_s28 + $0x8] sm:$0xff] %v1014_v10  ;;  %v1023_v27 = vadd.f32 %v1941_v4, %v985_v22  ;;  %v989_v30 = vld [vmem:[#allocation2 + $0x8] sm:$0xff]  ;;  %v1026_v33 = vadd.f32 %v1943_v5, %v988_v28  ;;  %v992_v36 = vld [vmem:[#allocation2 + $0x58] sm:$0xff]  ;;  %v1028_v37 = vadd.f32 %v1943_v5, %v990_v32  ;;  %v1029_v39 = vadd.f32 %v1941_v4, %v991_v34  ;;  %v995_v42 = vld [vmem:[#allocation2 + $0xe0] sm:$0xff] }
 0x191   : > { %1047 = vst [vmem:[%s1838_s28 + $0x10] sm:$0xff] %v1015_v11  ;;  %v1027_v35 = vadd.f32 %v1941_v4, %v989_v30  ;;  %v994_v40 = vld [vmem:[#allocation2 + $0xc8] sm:$0xff]  ;;  %v1030_v41 = vadd.f32 %v1943_v5, %v992_v36  ;;  %v1031_v43 = vadd.f32 %v1941_v4, %v993_v38  ;;  %v996_v44 = vld [vmem:[#allocation2 + $0x90] sm:$0xff]  ;;  %v1033_v47 = vadd.f32 %v1941_v4, %v995_v42  ;;  %v998_v48 = vld [vmem:[#allocation2 + $0xc0] sm:$0xff] }
 0x192   : > { %1048 = vst [vmem:[%s1838_s28 + $0x18] sm:$0xff] %v1016_v13  ;;  %v1032_v45 = vadd.f32 %v1943_v5, %v994_v40  ;;  %v997_v46 = vld [vmem:[#allocation2 + $0x70] sm:$0xff]  ;;  %v1034_v49 = vadd.f32 %v1943_v5, %v996_v44  ;;  %v999_v50 = vld [vmem:[#allocation2 + $0xa8] sm:$0xff]  ;;  %v1036_v53 = vadd.f32 %v1943_v5, %v998_v48  ;;  %v1003_v58 = vld [vmem:[#allocation2 + $0xa0] sm:$0xff] }
 0x193   : > { %1049 = vst [vmem:[%s1838_s28 + $0x20] sm:$0xff] %v1017_v15  ;;  %v1035_v51 = vadd.f32 %v1941_v4, %v997_v46  ;;  %v1000_v52 = vld [vmem:[#allocation2 + $0xd0] sm:$0xff]  ;;  %v1037_v55 = vadd.f32 %v1941_v4, %v999_v50  ;;  %v1002_v56 = vld [vmem:[#allocation2 + $0x28] sm:$0xff]  ;;  %v1004_v60 = vld [vmem:[#allocation2 + $0xf8] sm:$0xff]  ;;  %v1041_v63 = vadd.f32 %v1941_v4, %v1003_v58 }
 0x194   : > { %1050 = vst [vmem:[%s1838_s28 + $0x28] sm:$0xff] %v1018_v17  ;;  %v1001_v54 = vld [vmem:[#allocation2 + $0x10] sm:$0xff]  ;;  %v1038_v57 = vadd.f32 %v1943_v5, %v1000_v52  ;;  %v1040_v61 = vadd.f32 %v1943_v5, %v1002_v56  ;;  %v1005_v62 = vld [vmem:[#allocation2 + $0x20] sm:$0xff]  ;;  %v1006_v0 = vld [vmem:[#allocation2 + $0x98] sm:$0xff]  ;;  %v1042_v1 = vadd.f32 %v1943_v5, %v1004_v60 }
 0x195   : > { %1051 = vst [vmem:[%s1838_s28 + $0x30] sm:$0xff] %v1019_v19  ;;  %v1039_v59 = vadd.f32 %v1941_v4, %v1001_v54  ;;  %v1043_v2 = vadd.f32 %v1941_v4, %v1005_v62  ;;  %v1044_v3 = vadd.f32 %v1943_v5, %v1006_v0 }
 0x196   : > { %1052 = vst [vmem:[%s1838_s28 + $0x38] sm:$0xff] %v1020_v21 }
 0x197   : > { %1053 = vst [vmem:[%s1838_s28 + $0x40] sm:$0xff] %v1021_v23 }
 0x198   : > { %1054 = vst [vmem:[%s1838_s28 + $0x48] sm:$0xff] %v1022_v25 }
 0x199   : > { %1055 = vst [vmem:[%s1838_s28 + $0x50] sm:$0xff] %v1023_v27 }
 0x19a   : > { %1056 = vst [vmem:[%s1838_s28 + $0x58] sm:$0xff] %v1024_v29 }
 0x19b   : > { %1057 = vst [vmem:[%s1838_s28 + $0x60] sm:$0xff] %v1025_v31 }
 0x19c   : > { %1058 = vst [vmem:[%s1838_s28 + $0x68] sm:$0xff] %v1026_v33 }
 0x19d   : > { %1059 = vst [vmem:[%s1838_s28 + $0x70] sm:$0xff] %v1027_v35 }
 0x19e   : > { %1060 = vst [vmem:[%s1838_s28 + $0x78] sm:$0xff] %v1028_v37 }
 0x19f   : > { %1061 = vst [vmem:[%s1838_s28 + $0x80] sm:$0xff] %v1029_v39 }
 0x1a0   : > { %1062 = vst [vmem:[%s1838_s28 + $0x88] sm:$0xff] %v1030_v41 }
 0x1a1   : > { %1063 = vst [vmem:[%s1838_s28 + $0x90] sm:$0xff] %v1031_v43 }
 0x1a2   : > { %1064 = vst [vmem:[%s1838_s28 + $0x98] sm:$0xff] %v1032_v45 }
 0x1a3   : > { %1065 = vst [vmem:[%s1838_s28 + $0xa0] sm:$0xff] %v1033_v47 }
 0x1a4   : > { %1066 = vst [vmem:[%s1838_s28 + $0xa8] sm:$0xff] %v1034_v49 }
 0x1a5   : > { %1067 = vst [vmem:[%s1838_s28 + $0xb0] sm:$0xff] %v1035_v51 }
 0x1a6   : > { %1068 = vst [vmem:[%s1838_s28 + $0xb8] sm:$0xff] %v1036_v53 }
 0x1a7   : > { %1069 = vst [vmem:[%s1838_s28 + $0xc0] sm:$0xff] %v1037_v55 }
 0x1a8   : > { %1070 = vst [vmem:[%s1838_s28 + $0xc8] sm:$0xff] %v1038_v57 }
 0x1a9   : > { %1071 = vst [vmem:[%s1838_s28 + $0xd0] sm:$0xff] %v1039_v59 }
 0x1aa   : > { %1072 = vst [vmem:[%s1838_s28 + $0xd8] sm:$0xff] %v1040_v61 }
 0x1ab   : > { %1073 = vst [vmem:[%s1838_s28 + $0xe0] sm:$0xff] %v1041_v63 }
 0x1ac   : > { %1074 = vst [vmem:[%s1838_s28 + $0xe8] sm:$0xff] %v1042_v1 }
 0x1ad   : > { %1075 = vst [vmem:[%s1838_s28 + $0xf0] sm:$0xff] %v1043_v2 }
 0x1ae   : > { %1076 = vst [vmem:[%s1838_s28 + $0xf8] sm:$0xff] %v1044_v3 }
 0x1af PF: > { %s1481_s17 = sshll.u32 %s1670_s18, 8  ;;  %s1093_s23 = sshll.u32 %s1838_s28, 4  ;;  %s1094_s23 = int_to_ptr.vmem [resolvable:$true] %s1093_s23 }
 0x1b0   : > { %s1092_s22 = scalar_lea.hbm %s2063_s3, %s1481_s17  ;;  %s1078_s4 = scalar_lea.sflag [#allocation5], %s331_s9 }
 0x1b1   : > { %s1095_s27 = sshll.u32 %s1092_s22, 4  ;;  %s1592_s18 = scalar_lea.hbm %s2063_s3, 512  ;;  %s1096_s27 = int_to_ptr.hbm [resolvable:$true] %s1095_s27 }
 0x1b2   : > { %s1586_s29 = sshra.s32 %s1096_s27, 4  ;;  %s1587_s29 = int_to_ptr.hbm [resolvable:$true] %s1586_s29 }
 0x1b3   : > { %s1588_s26 = scalar_lea.hbm %s1587_s29, 256  ;;  %p1593_p10 = scmp.lt.s32.totalorder %s1587_s29, %s2063_s3 }
 0x1b4   : > { %p1589_p6 = scmp.ne.s32.totalorder %s1587_s29, %s1588_s26  ;;  %p1594_p11 = scmp.lt.s32.totalorder %s1592_s18, %s1588_s26 }
 0x1b6   : > { %p1590_p8 = pnand %p1589_p6, %p1779_p7  ;;  %p1595_p13 = por %p1594_p11, %p1593_p10 }
 0x1b8   : > { %p1591_p9 = pneg %p1590_p8 }
 0x1ba   : > { %p1596_p0 = pnand %p1595_p13, %p1591_p9 }
 0x1bc   : > { %1599 = shalt.err (!%p1596_p0)
}
 0x1bd   : > { %s1685_s9 = smov 256   ;;  %s1686_s28 = smov 16  }
 0x1be   : > { %1482 = dma.vmem_to_hbm [thread:$0]  (%p1779_p7), %s1094_s23, 4096, %s1096_s27, %s1078_s4, %s1685_s9, %s1685_s9, %s1686_s28  }
 0x1bf PF: > { %p1488_p1 = scmp.ge.s32.totalorder %s1682_s21, 2  ;;  %s1110_s17 = sand.u32 1, %s1646_s12  }
 0x1c0   : > { %s1111_s0 = scalar_lea.sflag [#allocation5], %s1110_s17 }
 0x1c1   : > { %p1485_p2 = pnand %p1488_p1, %p1787_p12 }
 0x1c3   : > { %p1486_p3 = pneg %p1485_p2 }
 0x1c5   : > { %1641 = dma.done.wait (%p1486_p3), %s1111_s0, 4096  }
 0x1c6   : > { %1643 = vsyncadd (%p1486_p3), %s1111_s0, 4294963200  ;;  %s16_s21 = sadd.s32 1, %s1682_s21   ;;  %s2069_s12 = smov %s1650_s13 }
 0x1c7   : > { %p13_p4 = scmp.ge.s32.totalorder %s16_s21, 6   ;;  %s2070_s13 = smov %s1654_s14 }
 0x1c8   : > { %s2071_s14 = smov %s1792_s7  ;;  %s2072_s15 = smov %s1662_s16 }
 0x1c9   : > { %s2073_s16 = smov %s1795_s8  ;;  %s2074_s17 = smov %s1674_s19 }
 0x1ca   : > { %s2075_s18 = smov %s1678_s20  ;;  %s2076_s19 = smov %s2079_s24 }
 0x1cb   : > { %s2077_s20 = smov %s2083_s25  ;;  %15 = sbr.rel (!%p13_p4) target bundleno = 8 (0x8), region = 124 }
 0x1d0   :  { %1117 = vsyncpa [#allocation5], 1 }
 0x1d1   :  { %1119 = vsyncpa [#allocation5 + $0x1], 1 }

</bundles_post_ra>
